<compile_context>
chip_gen: v5e
topology: v5e:2x2
jax: 0.10.0
libtpu: 0.0.40
codegen_flags: <defaults>
</compile_context>

<pallas_src>
import math

import jax
import jax.numpy as jnp
from jax.experimental import pallas as pl
from jax.experimental.pallas import tpu as pltpu


MAX_FOLD = 8  # cap on the channel->lane fold factor


def ca_kernel(x_ref, sel_ref, w1g_ref, b1_ref, w2g_ref, b2g_ref, o_ref):
    # x block: (nb, Cg, L) with L = g*HW lane-dense.  Channel c = cg*g + j
    # lives at sublane row cg, lanes [j*HW, (j+1)*HW).
    nb, cg, lanes = x_ref.shape
    g = sel_ref.shape[1]
    hw = lanes // g

    x = x_ref[...]                                              # io dtype

    # ---- mean pooling -------------------------------------------------------
    if jnp.dtype(x.dtype).itemsize < 4:
        # bf16 I/O: segment sums on the MXU (0/1 selector, f32 accumulate),
        # g-independent and no f32 upcast of the block.
        sel_b = jnp.broadcast_to(sel_ref[...], (nb, lanes, g))  # (nb, L, g)
        sums = jnp.einsum("bcl,blg->bcg", x, sel_b,
                          preferred_element_type=jnp.float32)   # (nb, cg, g)
        avgs = [sums[:, :, j] * (1.0 / hw) for j in range(g)]
    else:
        # f32 I/O: exact VPU mean per lane-group.
        avgs = [jnp.mean(x_ref[:, :, j * hw:(j + 1) * hw], axis=-1)
                for j in range(g)]                               # (nb, cg) f32

    # ---- max pooling per lane-group (VPU; g is small) -----------------------
    mxs = [jnp.max(x_ref[:, :, j * hw:(j + 1) * hw], axis=-1).astype(jnp.float32)
           for j in range(g)]                                    # (nb, cg) f32

    # ---- conv1 (+ReLU) per pool type; conv2 fused over avg+max --------------
    b1 = b1_ref[...]                                             # (1, Cr)
    pre_a = None
    pre_m = None
    for j in range(g):
        w1j = w1g_ref[j]                                         # (Cg, Cr)
        ta = jnp.dot(avgs[j], w1j, preferred_element_type=jnp.float32)
        tm = jnp.dot(mxs[j], w1j, preferred_element_type=jnp.float32)
        pre_a = ta if pre_a is None else pre_a + ta
        pre_m = tm if pre_m is None else pre_m + tm
    # conv2(relu(a)) + conv2(relu(m)) == (relu(a)+relu(m)) @ w2 + 2*b2
    hsum = jnp.maximum(pre_a + b1, 0.0) + jnp.maximum(pre_m + b1, 0.0)  # (nb, Cr)

    # ---- conv2 per lane-group -> sigmoid -> full-lane scale -----------------
    parts = []
    for j in range(g):
        att_j = (jnp.dot(hsum, w2g_ref[j], preferred_element_type=jnp.float32)
                 + 2.0 * b2g_ref[j])                             # (nb, Cg)
        scale_j = jax.nn.sigmoid(att_j).astype(x.dtype)          # (nb, Cg)
        parts.append(jnp.broadcast_to(scale_j[:, :, None], (nb, cg, hw)))
    scale = parts[0] if g == 1 else jnp.concatenate(parts, axis=-1)  # (nb, Cg, L)

    # single full-lane multiply + single unmasked store
    o_ref[...] = (x * scale).astype(o_ref.dtype)


def _pick_batch_block(n, per_img_bytes, cap_bytes):
    """Images per grid step: biggest block under cap, >=2 steps when N > 1,
    preferring an even step count (v7x megacore balance) and minimal padding."""
    max_nb = max(1, min(n, cap_bytes // max(1, per_img_bytes)))
    best_nb, best_key = 1, None
    for cand in range(1, max_nb + 1):
        steps = -(-n // cand)
        if n > 1 and steps < 2:          # keep >=2 steps for pipelining/megacore
            continue
        key = ((steps % 2 == 0) or steps == 1, -steps, -cand)
        if best_key is None or key > best_key:
            best_nb, best_key = cand, key
    return best_nb


def ca_layer(x, w1, b1, w2, b2, *, io_dtype=None, block_bytes_cap=None,
             donate_x=False):
    """Channel-attention forward.  x: (N, C, H, W) -> (N, C, H, W)."""
    N, C, H, W = x.shape
    HW = H * W
    Cr = w1.shape[1]

    if io_dtype is not None:
        x = x.astype(io_dtype)
    out_dtype = x.dtype
    itemsize = jnp.dtype(out_dtype).itemsize

    # ---- lane-density fold: (N, C, HW) -> (N, C//g, g*HW), g*HW % 128 == 0 --
    if HW % 128 == 0:
        g = 1
    else:
        g = 128 // math.gcd(HW, 128)
        if g > MAX_FOLD or C % g != 0:
            # TODO(synk): spatial sizes nearly coprime with 128 (e.g. 7x7) fall
            # back to masked-lane blocks; a two-pass pool+apply kernel would
            # keep those lane-dense too.
            g = 1
    Cg = C // g
    L = g * HW
    x3 = x.reshape(N, Cg, L)

    # ---- 0/1 lane-group selector (exact in any dtype) for the MXU mean ------
    lane_group = jnp.arange(L, dtype=jnp.int32) // HW
    sel = (lane_group[:, None] == jnp.arange(g, dtype=jnp.int32)[None, :]
           ).astype(out_dtype)                                   # (L, g)

    # ---- regroup the 1x1-conv weights to the folded channel order -----------
    w1 = w1.astype(jnp.float32)
    b1 = b1.astype(jnp.float32)
    w2 = w2.astype(jnp.float32)
    b2 = b2.astype(jnp.float32)
    w1g = jnp.stack([w1[j::g, :] for j in range(g)], axis=0)     # (g, Cg, Cr)
    w2g = jnp.stack([w2[:, j::g] for j in range(g)], axis=0)     # (g, Cr, Cg)
    b2g = jnp.stack([b2[:, j::g] for j in range(g)], axis=0)     # (g, 1, Cg)

    # ---- generation-aware block sizing & VMEM limit --------------------------
    vmem_phys = 64 << 20                     # v7x-safe default
    try:
        info = pltpu.get_tpu_info()
        vmem_phys = int(getattr(info, "vmem_capacity_bytes", vmem_phys))
    except Exception:
        pass
    if block_bytes_cap is None:
        # 128 MiB parts (v5e/v6e): big blocks; 64 MiB parts (v7x): ~6 MiB.
        block_bytes_cap = (12 << 20) if vmem_phys >= (96 << 20) else (6 << 20)

    per_img = C * HW * itemsize
    nb = _pick_batch_block(N, per_img, block_bytes_cap)
    grid = (pl.cdiv(N, nb),)

    block_bytes = nb * Cg * L * itemsize
    weight_bytes = (4 * (w1g.size + b1.size + w2g.size + b2g.size)
                    + sel.size * itemsize)
    # 2x double-buffered in + out blocks, ~3 block-sized in-kernel temporaries
    # (loaded x, lane-broadcast scale, product), weights, head-room.
    needed = 7 * block_bytes + 2 * weight_bytes + (4 << 20)
    vmem_limit = int(min(vmem_phys - (8 << 20), max(32 << 20, needed)))

    extra = {}
    if donate_x and N % nb == 0:   # alias only when blocks tile N exactly
        extra["input_output_aliases"] = {0: 0}

    out = pl.pallas_call(
        ca_kernel,
        out_shape=jax.ShapeDtypeStruct((N, Cg, L), out_dtype),
        grid=grid,
        in_specs=[
            pl.BlockSpec((nb, Cg, L), lambda n: (n, 0, 0)),      # x (lane-dense)
            pl.BlockSpec((L, g), lambda n: (0, 0)),              # mean selector
            pl.BlockSpec((g, Cg, Cr), lambda n: (0, 0, 0)),      # grouped w1
            pl.BlockSpec((1, Cr), lambda n: (0, 0)),             # b1
            pl.BlockSpec((g, Cr, Cg), lambda n: (0, 0, 0)),      # grouped w2
            pl.BlockSpec((g, 1, Cg), lambda n: (0, 0, 0)),       # grouped b2
        ],
        out_specs=pl.BlockSpec((nb, Cg, L), lambda n: (n, 0, 0)),
        compiler_params=pltpu.CompilerParams(
            dimension_semantics=("parallel",),
            vmem_limit_bytes=vmem_limit),
        **extra,
    )(x3, sel, w1g, b1, w2g, b2g)

    return out.reshape(N, C, H, W)


def ca_layer_ref(x, w1, b1, w2, b2):
    """Pure-JAX reference mirroring the PyTorch forward (f32)."""
    avg = x.mean(axis=(2, 3))
    mxp = x.max(axis=(2, 3))

    def mlp(p):
        return jnp.maximum(p @ w1 + b1[0], 0.0) @ w2 + b2[0]

    scale = jax.nn.sigmoid(mlp(avg) + mlp(mxp))
    return x * scale[:, :, None, None]


if __name__ == "__main__":
    key = jax.random.PRNGKey(0)

    def make_params(k, C, Cr):
        k1, k2, k3, k4 = jax.random.split(k, 4)
        return (jax.random.normal(k1, (C, Cr), jnp.float32) * 0.1,
                jax.random.normal(k2, (1, Cr), jnp.float32) * 0.1,
                jax.random.normal(k3, (Cr, C), jnp.float32) * 0.1,
                jax.random.normal(k4, (1, C), jnp.float32) * 0.1)

    # Test 1: CALayer(32, reduction=16), 8x8 maps (HW=64 -> lane fold g=2),
    # even 2-step grid (nb=4).
    N, C, H, W = 8, 32, 8, 8
    Cr = C // 16
    kx, kp, kr = jax.random.split(key, 3)
    x = jax.random.normal(kx, (N, C, H, W), jnp.float32)
    w1, b1, w2, b2 = make_params(kp, C, Cr)
    out = jax.block_until_ready(ca_layer(x, w1, b1, w2, b2))
    ref = ca_layer_ref(x, w1, b1, w2, b2)
    assert out.shape == (N, C, H, W)
    assert jnp.allclose(out, ref, atol=1e-5, rtol=1e-5), "f32 (g=2) mismatch"

    # Test 2: lane-dense spatial (16x16 -> g=1) with a non-divisor batch
    # (N=5 exercises the cdiv grid / partial last block).
    N2, C2, H2, W2 = 5, 32, 16, 16
    kx2, kp2 = jax.random.split(kr)
    x2 = jax.random.normal(kx2, (N2, C2, H2, W2), jnp.float32)
    p2 = make_params(kp2, C2, C2 // 16)
    out2 = jax.block_until_ready(ca_layer(x2, *p2))
    ref2 = ca_layer_ref(x2, *p2)
    assert jnp.allclose(out2, ref2, atol=1e-5, rtol=1e-5), "f32 (g=1, N=5) mismatch"

    # Test 3: bf16 I/O (MXU mean pooling, f32 accumulation, bf16 apply).
    out_bf = jax.block_until_ready(
        ca_layer(x, w1, b1, w2, b2, io_dtype=jnp.bfloat16))
    ref_bf = ca_layer_ref(x.astype(jnp.bfloat16).astype(jnp.float32),
                          w1, b1, w2, b2)
    assert out_bf.dtype == jnp.bfloat16
    assert jnp.allclose(out_bf.astype(jnp.float32), ref_bf,
                        atol=2e-2, rtol=2e-2), "bf16 mismatch"

    print("KERNEL_OK")
</pallas_src>

<mosaic_0001>
module attributes {stable_mosaic.version = 11 : i64} {
  func.func @ca_kernel(%arg0: i32, %arg1: memref<4x16x128xf32, #tpu.memory_space<vmem>>, %arg2: memref<128x2xf32, #tpu.memory_space<vmem>>, %arg3: memref<2x16x2xf32, #tpu.memory_space<vmem>>, %arg4: memref<1x2xf32, #tpu.memory_space<vmem>>, %arg5: memref<2x2x16xf32, #tpu.memory_space<vmem>>, %arg6: memref<2x1x16xf32, #tpu.memory_space<vmem>>, %arg7: memref<4x16x128xf32, #tpu.memory_space<vmem>>) attributes {dimension_semantics = [#tpu.dimension_semantics<parallel>], iteration_bounds = array<i64: 2>, scalar_prefetch = 0 : i64, scratch_operands = 0 : i64, tpu.core_type = #tpu.core_type<tc>, window_params = [{transform_indices = @transform_0, window_bounds = array<i64: 4, 16, 128>}, {pipeline_mode = #tpu.pipeline_mode<synchronous>, transform_indices = @transform_1, window_bounds = array<i64: 128, 2>}, {pipeline_mode = #tpu.pipeline_mode<synchronous>, transform_indices = @transform_2, window_bounds = array<i64: 2, 16, 2>}, {pipeline_mode = #tpu.pipeline_mode<synchronous>, transform_indices = @transform_3, window_bounds = array<i64: 1, 2>}, {pipeline_mode = #tpu.pipeline_mode<synchronous>, transform_indices = @transform_4, window_bounds = array<i64: 2, 2, 16>}, {pipeline_mode = #tpu.pipeline_mode<synchronous>, transform_indices = @transform_5, window_bounds = array<i64: 2, 1, 16>}, {transform_indices = @transform_6, window_bounds = array<i64: 4, 16, 128>}]} {
    %c0 = arith.constant 0 : index
    %c0_0 = arith.constant 0 : index
    %c0_1 = arith.constant 0 : index
    %0 = vector.load %arg1[%c0, %c0_0, %c0_1] : memref<4x16x128xf32, #tpu.memory_space<vmem>>, vector<4x16x128xf32>
    %c0_2 = arith.constant 0 : index
    %c0_3 = arith.constant 0 : index
    %c0_4 = arith.constant 0 : index
    %1 = vector.load %arg1[%c0_2, %c0_3, %c0_4] : memref<4x16x128xf32, #tpu.memory_space<vmem>>, vector<4x16x64xf32>
    %cst = arith.constant dense<0.000000e+00> : vector<4x16xf32>
    %2 = vector.multi_reduction <add>, %1, %cst [2] : vector<4x16x64xf32> to vector<4x16xf32>
    %cst_5 = arith.constant 6.400000e+01 : f32
    %3 = vector.broadcast %cst_5 : f32 to vector<4x16xf32>
    %4 = arith.divf %2, %3 : vector<4x16xf32>
    %c0_6 = arith.constant 0 : index
    %c0_7 = arith.constant 0 : index
    %c64 = arith.constant 64 : index
    %5 = vector.load %arg1[%c0_6, %c0_7, %c64] : memref<4x16x128xf32, #tpu.memory_space<vmem>>, vector<4x16x64xf32>
    %cst_8 = arith.constant dense<0.000000e+00> : vector<4x16xf32>
    %6 = vector.multi_reduction <add>, %5, %cst_8 [2] : vector<4x16x64xf32> to vector<4x16xf32>
    %cst_9 = arith.constant 6.400000e+01 : f32
    %7 = vector.broadcast %cst_9 : f32 to vector<4x16xf32>
    %8 = arith.divf %6, %7 : vector<4x16xf32>
    %c0_10 = arith.constant 0 : index
    %c0_11 = arith.constant 0 : index
    %c0_12 = arith.constant 0 : index
    %9 = vector.load %arg1[%c0_10, %c0_11, %c0_12] : memref<4x16x128xf32, #tpu.memory_space<vmem>>, vector<4x16x64xf32>
    %cst_13 = arith.constant dense<0xFF800000> : vector<4x16xf32>
    %10 = vector.multi_reduction <maximumf>, %9, %cst_13 [2] : vector<4x16x64xf32> to vector<4x16xf32>
    %c0_14 = arith.constant 0 : index
    %c0_15 = arith.constant 0 : index
    %c64_16 = arith.constant 64 : index
    %11 = vector.load %arg1[%c0_14, %c0_15, %c64_16] : memref<4x16x128xf32, #tpu.memory_space<vmem>>, vector<4x16x64xf32>
    %cst_17 = arith.constant dense<0xFF800000> : vector<4x16xf32>
    %12 = vector.multi_reduction <maximumf>, %11, %cst_17 [2] : vector<4x16x64xf32> to vector<4x16xf32>
    %c0_18 = arith.constant 0 : index
    %c0_19 = arith.constant 0 : index
    %13 = vector.load %arg4[%c0_18, %c0_19] : memref<1x2xf32, #tpu.memory_space<vmem>>, vector<1x2xf32>
    %c0_20 = arith.constant 0 : index
    %c0_21 = arith.constant 0 : index
    %c0_22 = arith.constant 0 : index
    %14 = vector.load %arg3[%c0_20, %c0_21, %c0_22] : memref<2x16x2xf32, #tpu.memory_space<vmem>>, vector<1x16x2xf32>
    %15 = vector.shape_cast %14 : vector<1x16x2xf32> to vector<16x2xf32>
    %cst_23 = arith.constant dense<0.000000e+00> : vector<4x2xf32>
    %16 = tpu.matmul %4, %15, %cst_23 {dimension_numbers = #tpu.dot_dimension_numbers<[1], [0], [0], [1], [0, 0, 1, 1], [], []>} : vector<4x16xf32>, vector<16x2xf32>, vector<4x2xf32> -> vector<4x2xf32>
    %cst_24 = arith.constant dense<0.000000e+00> : vector<4x2xf32>
    %17 = tpu.matmul %10, %15, %cst_24 {dimension_numbers = #tpu.dot_dimension_numbers<[1], [0], [0], [1], [0, 0, 1, 1], [], []>} : vector<4x16xf32>, vector<16x2xf32>, vector<4x2xf32> -> vector<4x2xf32>
    %c1 = arith.constant 1 : index
    %c0_25 = arith.constant 0 : index
    %c0_26 = arith.constant 0 : index
    %18 = vector.load %arg3[%c1, %c0_25, %c0_26] : memref<2x16x2xf32, #tpu.memory_space<vmem>>, vector<1x16x2xf32>
    %19 = vector.shape_cast %18 : vector<1x16x2xf32> to vector<16x2xf32>
    %cst_27 = arith.constant dense<0.000000e+00> : vector<4x2xf32>
    %20 = tpu.matmul %8, %19, %cst_27 {dimension_numbers = #tpu.dot_dimension_numbers<[1], [0], [0], [1], [0, 0, 1, 1], [], []>} : vector<4x16xf32>, vector<16x2xf32>, vector<4x2xf32> -> vector<4x2xf32>
    %cst_28 = arith.constant dense<0.000000e+00> : vector<4x2xf32>
    %21 = tpu.matmul %12, %19, %cst_28 {dimension_numbers = #tpu.dot_dimension_numbers<[1], [0], [0], [1], [0, 0, 1, 1], [], []>} : vector<4x16xf32>, vector<16x2xf32>, vector<4x2xf32> -> vector<4x2xf32>
    %22 = arith.addf %16, %20 : vector<4x2xf32>
    %23 = arith.addf %17, %21 : vector<4x2xf32>
    %24 = vector.broadcast %13 : vector<1x2xf32> to vector<4x2xf32>
    %25 = arith.addf %22, %24 : vector<4x2xf32>
    %cst_29 = arith.constant 0.000000e+00 : f32
    %26 = vector.broadcast %cst_29 : f32 to vector<4x2xf32>
    %27 = arith.maximumf %25, %26 : vector<4x2xf32>
    %28 = vector.broadcast %13 : vector<1x2xf32> to vector<4x2xf32>
    %29 = arith.addf %23, %28 : vector<4x2xf32>
    %cst_30 = arith.constant 0.000000e+00 : f32
    %30 = vector.broadcast %cst_30 : f32 to vector<4x2xf32>
    %31 = arith.maximumf %29, %30 : vector<4x2xf32>
    %32 = arith.addf %27, %31 : vector<4x2xf32>
    %c0_31 = arith.constant 0 : index
    %c0_32 = arith.constant 0 : index
    %c0_33 = arith.constant 0 : index
    %33 = vector.load %arg5[%c0_31, %c0_32, %c0_33] : memref<2x2x16xf32, #tpu.memory_space<vmem>>, vector<1x2x16xf32>
    %34 = vector.shape_cast %33 : vector<1x2x16xf32> to vector<2x16xf32>
    %cst_34 = arith.constant dense<0.000000e+00> : vector<4x16xf32>
    %35 = tpu.matmul %32, %34, %cst_34 {dimension_numbers = #tpu.dot_dimension_numbers<[1], [0], [0], [1], [0, 0, 1, 1], [], []>} : vector<4x2xf32>, vector<2x16xf32>, vector<4x16xf32> -> vector<4x16xf32>
    %c0_35 = arith.constant 0 : index
    %c0_36 = arith.constant 0 : index
    %c0_37 = arith.constant 0 : index
    %36 = vector.load %arg6[%c0_35, %c0_36, %c0_37] : memref<2x1x16xf32, #tpu.memory_space<vmem>>, vector<1x1x16xf32>
    %37 = vector.shape_cast %36 : vector<1x1x16xf32> to vector<1x16xf32>
    %cst_38 = arith.constant 2.000000e+00 : f32
    %38 = vector.broadcast %cst_38 : f32 to vector<1x16xf32>
    %39 = arith.mulf %38, %37 : vector<1x16xf32>
    %40 = vector.broadcast %39 : vector<1x16xf32> to vector<4x16xf32>
    %41 = arith.addf %35, %40 : vector<4x16xf32>
    %42 = arith.negf %41 : vector<4x16xf32>
    %43 = math.exp %42 : vector<4x16xf32>
    %cst_39 = arith.constant 1.000000e+00 : f32
    %44 = vector.broadcast %cst_39 : f32 to vector<4x16xf32>
    %45 = arith.addf %44, %43 : vector<4x16xf32>
    %46 = arith.divf %44, %45 : vector<4x16xf32>
    %47 = vector.shape_cast %46 : vector<4x16xf32> to vector<4x16x1xf32>
    %48 = vector.shape_cast %47 : vector<4x16x1xf32> to vector<4x16x1xf32>
    %49 = vector.broadcast %48 : vector<4x16x1xf32> to vector<4x16x64xf32>
    %c1_40 = arith.constant 1 : index
    %c0_41 = arith.constant 0 : index
    %c0_42 = arith.constant 0 : index
    %50 = vector.load %arg5[%c1_40, %c0_41, %c0_42] : memref<2x2x16xf32, #tpu.memory_space<vmem>>, vector<1x2x16xf32>
    %51 = vector.shape_cast %50 : vector<1x2x16xf32> to vector<2x16xf32>
    %cst_43 = arith.constant dense<0.000000e+00> : vector<4x16xf32>
    %52 = tpu.matmul %32, %51, %cst_43 {dimension_numbers = #tpu.dot_dimension_numbers<[1], [0], [0], [1], [0, 0, 1, 1], [], []>} : vector<4x2xf32>, vector<2x16xf32>, vector<4x16xf32> -> vector<4x16xf32>
    %c1_44 = arith.constant 1 : index
    %c0_45 = arith.constant 0 : index
    %c0_46 = arith.constant 0 : index
    %53 = vector.load %arg6[%c1_44, %c0_45, %c0_46] : memref<2x1x16xf32, #tpu.memory_space<vmem>>, vector<1x1x16xf32>
    %54 = vector.shape_cast %53 : vector<1x1x16xf32> to vector<1x16xf32>
    %cst_47 = arith.constant 2.000000e+00 : f32
    %55 = vector.broadcast %cst_47 : f32 to vector<1x16xf32>
    %56 = arith.mulf %55, %54 : vector<1x16xf32>
    %57 = vector.broadcast %56 : vector<1x16xf32> to vector<4x16xf32>
    %58 = arith.addf %52, %57 : vector<4x16xf32>
    %59 = arith.negf %58 : vector<4x16xf32>
    %60 = math.exp %59 : vector<4x16xf32>
    %cst_48 = arith.constant 1.000000e+00 : f32
    %61 = vector.broadcast %cst_48 : f32 to vector<4x16xf32>
    %62 = arith.addf %61, %60 : vector<4x16xf32>
    %63 = arith.divf %61, %62 : vector<4x16xf32>
    %64 = vector.shape_cast %63 : vector<4x16xf32> to vector<4x16x1xf32>
    %65 = vector.shape_cast %64 : vector<4x16x1xf32> to vector<4x16x1xf32>
    %66 = vector.broadcast %65 : vector<4x16x1xf32> to vector<4x16x64xf32>
    %67 = tpu.concatenate %49, %66 in 2 : vector<4x16x64xf32>, vector<4x16x64xf32> -> vector<4x16x128xf32>
    %68 = arith.mulf %0, %67 : vector<4x16x128xf32>
    %c0_49 = arith.constant 0 : index
    %c0_50 = arith.constant 0 : index
    %c0_51 = arith.constant 0 : index
    %69 = vector.load %arg7[%c0_49, %c0_50, %c0_51] : memref<4x16x128xf32, #tpu.memory_space<vmem>>, vector<4x16x128xf32>
    tpu.vector_store %arg7[%c0_49, %c0_50, %c0_51], %68 {strides = array<i32>} : memref<4x16x128xf32, #tpu.memory_space<vmem>>, vector<4x16x128xf32>,
    return
  }
  func.func @transform_0(%arg0: i32) -> (i32, i32, i32) {
    %c0_i32 = arith.constant 0 : i32
    %c0_i32_0 = arith.constant 0 : i32
    %c0_i32_1 = arith.constant 0 : i32
    return %arg0, %c0_i32, %c0_i32_0 : i32, i32, i32
  }
  func.func @transform_1(%arg0: i32) -> (i32, i32) {
    %c0_i32 = arith.constant 0 : i32
    %c0_i32_0 = arith.constant 0 : i32
    %c0_i32_1 = arith.constant 0 : i32
    return %c0_i32, %c0_i32_0 : i32, i32
  }
  func.func @transform_2(%arg0: i32) -> (i32, i32, i32) {
    %c0_i32 = arith.constant 0 : i32
    %c0_i32_0 = arith.constant 0 : i32
    %c0_i32_1 = arith.constant 0 : i32
    %c0_i32_2 = arith.constant 0 : i32
    return %c0_i32, %c0_i32_0, %c0_i32_1 : i32, i32, i32
  }
  func.func @transform_3(%arg0: i32) -> (i32, i32) {
    %c0_i32 = arith.constant 0 : i32
    %c0_i32_0 = arith.constant 0 : i32
    %c0_i32_1 = arith.constant 0 : i32
    return %c0_i32, %c0_i32_0 : i32, i32
  }
  func.func @transform_4(%arg0: i32) -> (i32, i32, i32) {
    %c0_i32 = arith.constant 0 : i32
    %c0_i32_0 = arith.constant 0 : i32
    %c0_i32_1 = arith.constant 0 : i32
    %c0_i32_2 = arith.constant 0 : i32
    return %c0_i32, %c0_i32_0, %c0_i32_1 : i32, i32, i32
  }
  func.func @transform_5(%arg0: i32) -> (i32, i32, i32) {
    %c0_i32 = arith.constant 0 : i32
    %c0_i32_0 = arith.constant 0 : i32
    %c0_i32_1 = arith.constant 0 : i32
    %c0_i32_2 = arith.constant 0 : i32
    return %c0_i32, %c0_i32_0, %c0_i32_1 : i32, i32, i32
  }
  func.func @transform_6(%arg0: i32) -> (i32, i32, i32) {
    %c0_i32 = arith.constant 0 : i32
    %c0_i32_0 = arith.constant 0 : i32
    %c0_i32_1 = arith.constant 0 : i32
    return %arg0, %c0_i32, %c0_i32_0 : i32, i32, i32
  }
}

</mosaic_0001>

<bundles_post_ra>
// kernel: tpu_custom_call.1
= control target key start
LH: loop header
LB: loop body
LE: loop exit
PB: predicated region body
PF: predicated region fallthrough
CT: control target
= control target key end

     0   :  { %11 = vsyncpa [#allocation3], 0  ;;  %s1453_s0 = inlined_call_operand.vmem [shape: f32[8,16,128], index: 0, kind: input, shape index: {}]   ;;  %s1454_s1 = inlined_call_operand.vmem [shape: f32[128,2], index: 1, kind: input, shape index: {}]   ;;  %s1455_s2 = inlined_call_operand.vmem [shape: f32[2,16,2], index: 2, kind: input, shape index: {}]   ;;  %s1456_s3 = inlined_call_operand.vmem [shape: f32[1,2], index: 3, kind: input, shape index: {}]   ;;  %s1457_s4 = inlined_call_operand.vmem [shape: f32[2,2,16], index: 4, kind: input, shape index: {}]   ;;  %s1458_s5 = inlined_call_operand.vmem [shape: f32[2,1,16], index: 5, kind: input, shape index: {}]   ;;  %s1459_s6 = inlined_call_operand.hbm [shape: f32[8,16,128], index: 6, kind: output, shape index: {}]  }
   0x1   :  { %13 = vsyncpa [#allocation3 + $0x1], 0  ;;  %s1127_s21 = smov 0   ;;  %s1129_s1 = smov 0  }
   0x2   :  { %s1131_s22 = smov 0   ;;  %s1133_s23 = smov 0  }
   0x3 LB: > { %s1148_s24 = sadd.s32 4294967295, %s1086_s23   ;;  %s929_s25 = sadd.s32 4294967294, %s1086_s23   ;;  %s1086_s23 = sphi %s1133_s23, %s1465_s23   ;;  %s1082_s22 = sphi %s1131_s22, %s1464_s22   ;;  %s1078_s1 = sphi %s1129_s1, %s1463_s1   ;;  %s1074_s21 = sphi %s1127_s21, %s1462_s21  }
   0x4   : > { %s1152_s26 = sadd.s32 1, %s1086_s23   ;;  %s157_s27 = sadd.s32 1, %s1082_s22 }
   0x5   : > { %s154_s28 = ssub.s32 %s1086_s23, %s1152_s26  ;;  %p167_p0 = scmp.ne.s32.totalorder %s1082_s22, %s1078_s1 }
   0x6   : > { %p155_p1 = scmp.eq.s32.totalorder %s154_s28, 0  ;;  %p168_p2 = scmp.eq.s32.totalorder %s1148_s24, 1 }
   0x7   : > { %p173_p3 = scmp.ne.s32.totalorder %s1078_s1, %s1074_s21  ;;  %p174_p4 = scmp.eq.s32.totalorder %s929_s25, 1 }
   0x8   : > { %s1163_s29 = scalar_select %p155_p1, %s1082_s22, %s157_s27  }
   0x9   : > { %p1165_p5 = por %p168_p2, %p167_p0  ;;  %p1169_p6 = por %p174_p4, %p173_p3 }
   0xa   : > { %p932_p7 = scmp.ge.s32.totalorder %s1086_s23, 1  ;;  %p217_p8 = scmp.lt.s32.totalorder %s1086_s23, 3 }
   0xc   : > { %p218_p9 = pnand %p932_p7, %p217_p8 }
   0xd   : > { %s934_s8 = sshll.u32 (!%p218_p9), %s1148_s24, 2  ;;  %s1088_s13 = smov (!%p218_p9), 64  }
   0xe   : > { %221 = sbr.rel (%p218_p9) target bundleno = 771 (0x303), region = 44  ;;  %p249_p10 = scmp.lt.s32.totalorder (!%p218_p9), %s934_s8, 7 }
   0xf   : > { %s245_s16 = sand.u32 (!%p218_p9), 1, %s1078_s1   ;;  %s959_s19 = sshll.u32 (!%p218_p9), %s1148_s24, 6 }
  0x10   : > { %s933_s17 = sshll.u32 (!%p218_p9), %s245_s16, 6  ;;  %s863_s27 = scalar_lea.hbm (!%p218_p9), %s1459_s6, %s959_s19 }
  0x11   : > { %s1395_s18 = scalar_lea.vmem (!%p218_p9), [#allocation2], %s933_s17  ;;  %s851_s24 = scalar_lea.sflag (!%p218_p9), [#allocation3], %s245_s16 }
  0x12   : > { %s864_s28 = sshll.u32 (!%p218_p9), %s1395_s18, 4  ;;  %s865_s28 = int_to_ptr.vmem [resolvable:$true] %s864_s28 }
  0x13   : > { %s1467_s8 = smov (!%p249_p10, %s934_s8), 7  ;;  %vm264_vm0 = vcmask 523264   ;;  %vm392_vm1 = vcmask 1048064   ;;  %v1089_v48 = vmov 64.0   ;;  %v419_v50 = vld [vmem:[%s1455_s2 + $0x8] sm:$0xff]  ;;  %v418_v52 = vld [vmem:[%s1455_s2] sm:$0xff]  ;;  %v431_v58 = vlaneseq }
  0x14   : > { %s957_s9 = sshll.u32 %s1467_s8, 4  ;;  %1014 = vrcp.f32 %v1089_v48  ;;  %560 = vmatpush.msra.mxu2 %v419_v50  ;;  %605 = vmatpush.msra.mxu3 %v419_v50  ;;  %vm436_vm3 = vcmask 130112   ;;  %vm447_vm4 = vcmask 1041409   ;;  %vm449_vm5 = vcmask 1042434   ;;  %s866_s8 = sshll.u32 %s863_s27, 4  ;;  %s867_s8 = int_to_ptr.hbm [resolvable:$true] %s866_s8 }
  0x15   : > { %s253_s12 = scalar_lea.vmem %s1453_s0, %s957_s9  ;;  %v1268_v62 = vand.u32 127, %v431_v58  ;;  %vm451_vm6 = vcmask 1043459   ;;  %vm453_vm7 = vcmask 130048   ;;  %vm629_vm8 = vcmask 1041408   ;;  %s1038_s9 = sshra.s32 %s867_s8, 4  ;;  %s1039_s9 = int_to_ptr.hbm [resolvable:$true] %s1038_s9 }
  0x16   : > { %v1179_v0 = vld [vmem:[%s253_s12 + $0x20] sm:$0xff]  ;;  %v1181_v1 = vld [vmem:[%s253_s12 + $0x10] sm:$0xff]  ;;  %v1188_v3 = vld [vmem:[%s253_s12 + $0x28] sm:$0xff]  ;;  %561 = vmatpush.msra.mxu2 %v418_v52  ;;  %606 = vmatpush.msra.mxu3 %v418_v52  ;;  %vm625_vm9 = vcmask 15360   ;;  %s1040_s10 = scalar_lea.hbm %s1039_s9, 64  ;;  %p1045_p0 = scmp.lt.s32.totalorder %s1039_s9, %s1459_s6 }
  0x17   : > { %v1183_v2 = vld [vmem:[%s253_s12] sm:$0xff]  ;;  %320 = vrot.lane.b32.xlu2 %v1179_v0, %s1088_s13  ;;  %316 = vrot.lane.b32.xlu1 %v1181_v1, %s1088_s13  ;;  %v1190_v4 = vld [vmem:[%s253_s12 + $0x18] sm:$0xff]  ;;  %v271_v10 = vsel %vm264_vm0, %v1181_v1, 0.0  ;;  %v277_v12 = vsel %vm264_vm0, %v1179_v0, 0.0  ;;  %v280_v14 = vsel %vm264_vm0, %v1188_v3, 0.0  ;;  %v374_v18 = vsel %vm264_vm0, %v1181_v1, -inf  ;;  %p1041_p11 = scmp.ne.s32.totalorder %s1039_s9, %s1040_s10 }
  0x18   : > { %312 = vrot.lane.b32.xlu0 %v1183_v2, %s1088_s13  ;;  %v1192_v5 = vld [vmem:[%s253_s12 + $0x8] sm:$0xff]  ;;  %v1197_v6 = vld [vmem:[%s253_s12 + $0x38] sm:$0xff]  ;;  %v1199_v7 = vld [vmem:[%s253_s12 + $0x30] sm:$0xff]  ;;  %v265_v8 = vsel %vm264_vm0, %v1183_v2, 0.0  ;;  %v274_v9 = vsel %vm264_vm0, %v1190_v4, 0.0  ;;  %v368_v17 = vsel %vm264_vm0, %v1183_v2, -inf }
  0x19   : > { %v268_v11 = vsel %vm264_vm0, %v1192_v5, 0.0  ;;  %v283_v13 = vsel %vm264_vm0, %v1199_v7, 0.0  ;;  %v286_v15 = vsel %vm264_vm0, %v1197_v6, 0.0  ;;  %v371_v16 = vsel %vm264_vm0, %v1192_v5, -inf  ;;  %p1042_p12 = pnand %p1041_p11, %p1165_p5 }
  0x1a   : > { %v380_v19 = vsel %vm264_vm0, %v1179_v0, -inf  ;;  %v377_v20 = vsel %vm264_vm0, %v1190_v4, -inf  ;;  %v383_v21 = vsel %vm264_vm0, %v1188_v3, -inf  ;;  %v389_v22 = vsel %vm264_vm0, %v1197_v6, -inf  ;;  %v1015_v49 = vpop.eup %1014 }
  0x1b   : > { %v386_v23 = vsel %vm264_vm0, %v1199_v7, -inf  ;;  %v396_v24 = vsel %vm392_vm1, %v1192_v5, -inf  ;;  %v393_v25 = vsel %vm392_vm1, %v1183_v2, -inf  ;;  %v399_v26 = vsel %vm392_vm1, %v1181_v1, -inf  ;;  %p1043_p13 = pneg %p1042_p12 }
  0x1c   : > { %v402_v27 = vsel %vm392_vm1, %v1190_v4, -inf  ;;  %v411_v39 = vsel %vm392_vm1, %v1199_v7, -inf  ;;  %v405_v45 = vsel %vm392_vm1, %v1179_v0, -inf  ;;  %v408_v46 = vsel %vm392_vm1, %v1188_v3, -inf }
  0x1d   : > { %v414_v47 = vsel %vm392_vm1, %v1197_v6, -inf  ;;  %v290_v51 = vmul.f32 64.0, %v1015_v49  ;;  %vm294_vm2 = vweird.f32 %v1015_v49 }
  0x1f   : > { %322 = vrot.lane.b32.xlu2 %v1188_v3, %s1088_s13  ;;  %318 = vrot.lane.b32.xlu1 %v1190_v4, %s1088_s13  ;;  %v291_v54 = vsub.f32 1.0, %v290_v51 }
  0x20   : > { %314 = vrot.lane.b32.xlu0 %v1192_v5, %s1088_s13 }
  0x21   : > { %v292_v55 = vmul.f32 %v1015_v49, %v291_v54 }
  0x23   : > { %v293_v57 = vadd.f32 %v1015_v49, %v292_v55 }
  0x25   : > { %v1265_v61 = vsel %vm294_vm2, %v1015_v49, %v293_v57 }
  0x27   : > { %326 = vrot.lane.b32.xlu1 %v1197_v6, %s1088_s13 }
  0x28   : > { %324 = vrot.lane.b32.xlu0 %v1199_v7, %s1088_s13  ;;  %s1044_s13 = scalar_lea.hbm %s1459_s6, 128 }
  0x29   : > { %p1046_p1 = scmp.lt.s32.totalorder %s1044_s13, %s1040_s10 }
  0x2b   : > { %p1047_p2 = por %p1046_p1, %p1045_p0 }
  0x2d   : > { %p1048_p3 = pnand %p1047_p2, %p1043_p13 }
  0x48   : > { %266 = vadd.xlane.f32.xlu2 %v265_v8 }
  0x50   : > { %275 = vadd.xlane.f32.xlu2 %v274_v9  ;;  %v1272_v9 = vadd.s32 4294967288, %v1268_v62 }
  0x51   : > { %272 = vadd.xlane.f32.xlu1 %v271_v10 }
  0x52   : > { %269 = vadd.xlane.f32.xlu0 %v268_v11 }
  0x58   : > { %278 = vadd.xlane.f32.xlu2 %v277_v12 }
  0x59   : > { %284 = vadd.xlane.f32.xlu1 %v283_v13 }
  0x5a   : > { %281 = vadd.xlane.f32.xlu0 %v280_v14 }
  0x60   : > { %287 = vadd.xlane.f32.xlu2 %v286_v15 }
  0x61   : > { %372 = vmax.xlane.f32.xlu1 %v371_v16 }
  0x62   : > { %369 = vmax.xlane.f32.xlu0 %v368_v17 }
  0x68   : > { %375 = vmax.xlane.f32.xlu2 %v374_v18 }
  0x69   : > { %381 = vmax.xlane.f32.xlu1 %v380_v19 }
  0x6a   : > { %378 = vmax.xlane.f32.xlu0 %v377_v20 }
  0x70   : > { %384 = vmax.xlane.f32.xlu2 %v383_v21 }
  0x71   : > { %390 = vmax.xlane.f32.xlu1 %v389_v22  ;;  %v321_v28 = vpop.permute.xlu2 %320 }
  0x72   : > { %387 = vmax.xlane.f32.xlu0 %v386_v23  ;;  %v348_v41 = vsel %vm264_vm0, %v321_v28, 0.0 }
  0x78   : > { %397 = vmax.xlane.f32.xlu2 %v396_v24 }
  0x79   : > { %394 = vmax.xlane.f32.xlu1 %v393_v25  ;;  %v323_v33 = vpop.permute.xlu2 %322 }
  0x7a   : > { %400 = vmax.xlane.f32.xlu0 %v399_v26  ;;  %v351_v36 = vsel %vm264_vm0, %v323_v33, 0.0 }
  0x81   : > { %403 = vmax.xlane.f32.xlu1 %v402_v27 }
  0x89   : > { %v317_v29 = vpop.permute.xlu1 %316 }
  0x8a   : > { %v313_v30 = vpop.permute.xlu0 %312  ;;  %v342_v31 = vsel %vm264_vm0, %v317_v29, 0.0 }
  0x8b   : > { %343 = vadd.xlane.f32.xlu1 %v342_v31  ;;  %v336_v32 = vsel %vm264_vm0, %v313_v30, 0.0 }
  0x8c   : > { %337 = vadd.xlane.f32.xlu2 %v336_v32 }
  0x91   : > { %v319_v34 = vpop.permute.xlu1 %318 }
  0x92   : > { %v315_v35 = vpop.permute.xlu0 %314  ;;  %v345_v37 = vsel %vm264_vm0, %v319_v34, 0.0 }
  0x93   : > { %352 = vadd.xlane.f32.xlu1 %v351_v36  ;;  %v339_v38 = vsel %vm264_vm0, %v315_v35, 0.0 }
  0x94   : > { %340 = vadd.xlane.f32.xlu0 %v339_v38  ;;  %346 = vadd.xlane.f32.xlu2 %v345_v37 }
  0x99   : > { %v327_v43 = vpop.permute.xlu1 %326 }
  0x9a   : > { %v325_v40 = vpop.permute.xlu0 %324  ;;  %v357_v44 = vsel %vm264_vm0, %v327_v43, 0.0 }
  0x9b   : > { %v354_v42 = vsel %vm264_vm0, %v325_v40, 0.0  ;;  %412 = vmax.xlane.f32.xlu1 %v411_v39 }
  0x9c   : > { %349 = vadd.xlane.f32.xlu0 %v348_v41  ;;  %355 = vadd.xlane.f32.xlu2 %v354_v42 }
  0xa4   : > { %358 = vadd.xlane.f32.xlu0 %v357_v44  ;;  %406 = vmax.xlane.f32.xlu2 %v405_v45 }
  0xac   : > { %409 = vmax.xlane.f32.xlu0 %v408_v46  ;;  %415 = vmax.xlane.f32.xlu2 %v414_v47 }
  0xbb   : > { %v267_v53 = vpop.xlane.xlu2 %266 }
  0xbc   : > { %v296_v63 = vmul.f32 %v1265_v61, %v267_v53 }
  0xbe   : > { %v529_v17 = vperm.slane %v296_v63, %v1268_v62  ;;  %v938_v63 = vld [vmem:[%s1455_s2 + $0x18] sm:$0xff] }
  0xbf   : > { %470 = vmatpush.msra.mxu0 %v938_v63  ;;  %515 = vmatpush.msra.mxu1 %v938_v63 }
  0xc3   : > { %v276_v56 = vpop.xlane.xlu2 %275 }
  0xc4   : > { %v273_v59 = vpop.xlane.xlu1 %272  ;;  %v299_v10 = vmul.f32 %v1265_v61, %v276_v56 }
  0xc5   : > { %v270_v60 = vpop.xlane.xlu0 %269  ;;  %v298_v12 = vmul.f32 %v1265_v61, %v273_v59 }
  0xc6   : > { %v297_v11 = vmul.f32 %v1265_v61, %v270_v60  ;;  %v533_v18 = vperm.slane %v299_v10, %v1272_v9 }
  0xc7   : > { %v532_v20 = vperm.slane %v298_v12, %v1268_v62 }
  0xc8   : > { %v530_v19 = vperm.slane %v297_v11, %v1272_v9 }
  0xc9   : > { %v534_v26 = vsel %vm436_vm3, %v533_v18, %v532_v20 }
  0xca   : > { %v531_v25 = vsel %vm436_vm3, %v530_v19, %v529_v17 }
  0xcb   : > { %v279_v8 = vpop.xlane.xlu2 %278  ;;  %v541_v33 = vsel %vm447_vm4, %v534_v26, %v531_v25 }
  0xcc   : > { %v285_v13 = vpop.xlane.xlu1 %284  ;;  %v300_v14 = vmul.f32 %v1265_v61, %v279_v8  ;;  %v937_v8 = vld [vmem:[%s1455_s2 + $0x10] sm:$0xff] }
  0xcd   : > { %v282_v15 = vpop.xlane.xlu0 %281  ;;  %v302_v21 = vmul.f32 %v1265_v61, %v285_v13  ;;  %471 = vmatpush.msra.mxu0 %v937_v8  ;;  %516 = vmatpush.msra.mxu1 %v937_v8 }
  0xce   : > { %v301_v16 = vmul.f32 %v1265_v61, %v282_v15  ;;  %v535_v22 = vperm.slane %v300_v14, %v1268_v62 }
  0xcf   : > { %v538_v27 = vperm.slane %v302_v21, %v1268_v62 }
  0xd0   : > { %v536_v23 = vperm.slane %v301_v16, %v1272_v9 }
  0xd2   : > { %v537_v31 = vsel %vm436_vm3, %v536_v23, %v535_v22 }
  0xd3   : > { %v288_v24 = vpop.xlane.xlu2 %287  ;;  %v542_v35 = vsel %vm449_vm5, %v537_v31, %v541_v33 }
  0xd4   : > { %v303_v28 = vmul.f32 %v1265_v61, %v288_v24  ;;  %v373_v29 = vpop.xlane.xlu1 %372 }
  0xd5   : > { %v370_v30 = vpop.xlane.xlu0 %369  ;;  %v575_v39 = vperm.slane %v373_v29, %v1272_v9 }
  0xd6   : > { %v539_v32 = vperm.slane %v303_v28, %v1272_v9  ;;  %v574_v40 = vperm.slane %v370_v30, %v1268_v62 }
  0xd8   : > { %v540_v34 = vsel %vm436_vm3, %v539_v32, %v538_v27  ;;  %v576_v44 = vsel %vm436_vm3, %v575_v39, %v574_v40 }
  0xd9   : > { %v543_v36 = vsel %vm451_vm6, %v540_v34, %v542_v35 }
  0xda   : > { %941 = vmatmul.msk.f32.vlgmr.msra.gmra.mxu2 %vm453_vm7, %v543_v36 }
  0xdb   : > { %v376_v37 = vpop.xlane.xlu2 %375 }
  0xdc   : > { %v382_v38 = vpop.xlane.xlu1 %381  ;;  %v577_v41 = vperm.slane %v376_v37, %v1268_v62 }
  0xdd   : > { %v379_v42 = vpop.xlane.xlu0 %378  ;;  %v580_v46 = vperm.slane %v382_v38, %v1268_v62 }
  0xde   : > { %v578_v43 = vperm.slane %v379_v42, %v1272_v9 }
  0xe0   : > { %v579_v45 = vsel %vm436_vm3, %v578_v43, %v577_v41 }
  0xe1   : > { %v586_v50 = vsel %vm447_vm4, %v579_v45, %v576_v44 }
  0xe3   : > { %v385_v47 = vpop.xlane.xlu2 %384 }
  0xe4   : > { %v391_v48 = vpop.xlane.xlu1 %390  ;;  %v581_v49 = vperm.slane %v385_v47, %v1272_v9 }
  0xe5   : > { %v584_v51 = vperm.slane %v391_v48, %v1272_v9  ;;  %v388_v52 = vpop.xlane.xlu0 %387 }
  0xe6   : > { %v582_v53 = vsel %vm436_vm3, %v581_v49, %v580_v46  ;;  %v583_v54 = vperm.slane %v388_v52, %v1268_v62 }
  0xe7   : > { %v587_v55 = vsel %vm449_vm5, %v582_v53, %v586_v50 }
  0xe8   : > { %v585_v56 = vsel %vm436_vm3, %v584_v51, %v583_v54 }
  0xe9   : > { %v588_v57 = vsel %vm451_vm6, %v585_v56, %v587_v55 }
  0xea   : > { %942 = vmatmul.msk.f32.vlgmr.msra.gmra.mxu3 %vm453_vm7, %v588_v57 }
  0xeb   : > { %v398_v60 = vpop.xlane.xlu2 %397 }
  0xec   : > { %v395_v59 = vpop.xlane.xlu1 %394  ;;  %v485_v38 = vperm.slane %v398_v60, %v1272_v9 }
  0xed   : > { %v401_v11 = vpop.xlane.xlu0 %400  ;;  %v484_v41 = vperm.slane %v395_v59, %v1268_v62 }
  0xee   : > { %v487_v43 = vperm.slane %v401_v11, %v1268_v62 }
  0xef   : > { %v486_v49 = vsel %vm436_vm3, %v485_v38, %v484_v41 }
  0xf4   : > { %v404_v10 = vpop.xlane.xlu1 %403 }
  0xf5   : > { %v488_v42 = vperm.slane %v404_v10, %v1272_v9 }
  0xf7   : > { %v489_v50 = vsel %vm436_vm3, %v488_v42, %v487_v43 }
  0xf8   : > { %v496_v59 = vsel %vm447_vm4, %v489_v50, %v486_v49 }
  0xfe   : > { %v344_v13 = vpop.xlane.xlu1 %343 }
  0xff   : > { %v338_v12 = vpop.xlane.xlu2 %337  ;;  %v362_v22 = vmul.f32 %v344_v13, %v1265_v61 }
 0x100   : > { %v360_v23 = vmul.f32 %v338_v12, %v1265_v61  ;;  %v1013_v12 = vld [vmem:[%s1456_s3] ss:$0 sm:$0xff] }
 0x101   : > { %v438_v28 = vperm.slane %v362_v22, %v1268_v62  ;;  %v1372_v22 = vshrl.u32 %v431_v58, 7 }
 0x102   : > { %v433_v29 = vperm.slane %v360_v23, %v1268_v62 }
 0x103   : > { %1005 = vset.pattern.permute.xlu2 %v1372_v22  ;;  %1003 = vset.pattern.permute.xlu0 %v1372_v22  ;;  %v1377_v23 = vadd.s32 8, %v1372_v22 }
 0x105   : > { %1004 = vset.pattern.permute.xlu1 %v1377_v23 }
 0x106   : > { %v353_v18 = vpop.xlane.xlu1 %352 }
 0x107   : > { %v341_v14 = vpop.xlane.xlu0 %340  ;;  %v347_v15 = vpop.xlane.xlu2 %346  ;;  %v365_v24 = vmul.f32 %v353_v18, %v1265_v61 }
 0x108   : > { %v361_v19 = vmul.f32 %v341_v14, %v1265_v61  ;;  %v363_v20 = vmul.f32 %v347_v15, %v1265_v61 }
 0x109   : > { %v442_v31 = vperm.slane %v365_v24, %v1272_v9 }
 0x10a   : > { %v435_v25 = vperm.slane %v361_v19, %v1272_v9  ;;  %v439_v26 = vperm.slane %v363_v20, %v1272_v9 }
 0x10c   : > { %v437_v34 = vsel %vm436_vm3, %v435_v25, %v433_v29  ;;  %v440_v35 = vsel %vm436_vm3, %v439_v26, %v438_v28 }
 0x10d   : > { %v448_v44 = vsel %vm447_vm4, %v440_v35, %v437_v34 }
 0x10e   : > { %v413_v45 = vpop.xlane.xlu1 %412 }
 0x10f   : > { %v350_v16 = vpop.xlane.xlu0 %349  ;;  %v356_v17 = vpop.xlane.xlu2 %355  ;;  %v493_v48 = vperm.slane %v413_v45, %v1268_v62 }
 0x110   : > { %v364_v21 = vmul.f32 %v350_v16, %v1265_v61  ;;  %v366_v30 = vmul.f32 %v356_v17, %v1265_v61 }
 0x112   : > { %v441_v27 = vperm.slane %v364_v21, %v1268_v62  ;;  %v444_v39 = vperm.slane %v366_v30, %v1268_v62  ;;  %v620_v21 = vld [vmem:[%s1458_s5] sm:$0x1] }
 0x113   : > { %v621_v24 = vmul.f32 2.0, %v620_v21 }
 0x114   : > { %v443_v37 = vsel %vm436_vm3, %v442_v31, %v441_v27  ;;  %v947_v27 = vld [vmem:[%s1458_s5 + $0x1] sm:$0x1] }
 0x115   : > { %v623_v25 = vperm.slane %v621_v24, 0  ;;  %v728_v58 = vmul.f32 2.0, %v947_v27 }
 0x117   : > { %v359_v32 = vpop.xlane.xlu0 %358  ;;  %v407_v33 = vpop.xlane.xlu2 %406  ;;  %v730_v30 = vperm.slane %v728_v58, 0 }
 0x118   : > { %v367_v36 = vmul.f32 %v359_v32, %v1265_v61  ;;  %v450_v61 = vsel %vm449_vm5, %v443_v37, %v448_v44  ;;  %v490_v53 = vperm.slane %v407_v33, %v1268_v62  ;;  %v619_v62 = vld [vmem:[%s1457_s4] sm:$0x3] }
 0x119   : > { %943 = vmatpush.msk.msrb.mxu0 %vm629_vm8, %v619_v62 }
 0x11a   : > { %v445_v40 = vperm.slane %v367_v36, %v1272_v9 }
 0x11c   : > { %v446_v46 = vsel %vm436_vm3, %v445_v40, %v444_v39 }
 0x11d   : > { %v452_v47 = vsel %vm451_vm6, %v446_v46, %v450_v61 }
 0x11e   : > { %939 = vmatmul.msk.f32.vlgmr.msra.gmra.mxu0 %vm453_vm7, %v452_v47 }
 0x11f   : > { %v410_v51 = vpop.xlane.xlu0 %409  ;;  %v416_v52 = vpop.xlane.xlu2 %415 }
 0x120   : > { %v491_v54 = vperm.slane %v410_v51, %v1272_v9  ;;  %v494_v55 = vperm.slane %v416_v52, %v1272_v9  ;;  %v946_v9 = vld [vmem:[%s1457_s4 + $0x2] sm:$0x3] }
 0x121   : > { %948 = vmatpush.msk.msrb.mxu1 %vm629_vm8, %v946_v9 }
 0x122   : > { %v492_v56 = vsel %vm436_vm3, %v491_v54, %v490_v53  ;;  %v495_v57 = vsel %vm436_vm3, %v494_v55, %v493_v48 }
 0x123   : > { %v497_v60 = vsel %vm449_vm5, %v492_v56, %v496_v59 }
 0x124   : > { %v498_v63 = vsel %vm451_vm6, %v495_v57, %v497_v60 }
 0x125   : > { %940 = vmatmul.msk.f32.vlgmr.msra.gmra.mxu1 %vm453_vm7, %v498_v63 }
 0x15d   : > { %v563_v10 = vpop.f32.mrf.mxu2 }
 0x16d   : > { %v608_v13 = vpop.f32.mrf.mxu3 }
 0x19b   : > { %v473_v8 = vpop.f32.mrf.mxu0 }
 0x19c   : > { %v564_v11 = vadd.f32 %v563_v10, %v473_v8 }
 0x19e   : > { %v614_v15 = vadd.f32 %v1013_v12, %v564_v11 }
 0x1a0   : > { %v615_v18 = vmax.f32 %v614_v15, 0.0 }
 0x1a2   : > { %v518_v14 = vpop.f32.mrf.mxu1 }
 0x1a3   : > { %v609_v16 = vadd.f32 %v608_v13, %v518_v14 }
 0x1a5   : > { %v616_v17 = vadd.f32 %v1013_v12, %v609_v16 }
 0x1a7   : > { %v617_v19 = vmax.f32 %v616_v17, 0.0 }
 0x1a9   : > { %v618_v20 = vadd.f32 %v617_v19, %v615_v18 }
 0x1ab   : > { %944 = vmatmul.msk.f32.vlgmr.msrb.gmra.mxu0 %vm625_vm9, %v618_v20  ;;  %949 = vmatmul.msk.f32.vlgmr.msrb.gmra.mxu1 %vm625_vm9, %v618_v20 }
 0x228   : > { %v650_v26 = vpop.f32.mrf.mxu0  ;;  %v752_v31 = vpop.f32.mrf.mxu1 }
 0x229   : > { %v651_v28 = vadd.f32 %v650_v26, %v623_v25  ;;  %v753_v33 = vadd.f32 %v752_v31, %v730_v30 }
 0x22b   : > { %v945_v29 = vmul.f32 -1.442695, %v651_v28  ;;  %v950_v35 = vmul.f32 -1.442695, %v753_v33 }
 0x22d   : > { %1016 = vpow2.f32 %v945_v29 }
 0x233   : > { %v1017_v32 = vpop.eup %1016 }
 0x234   : > { %v656_v34 = vadd.f32 1.0, %v1017_v32 }
 0x236   : > { %1018 = vrcp.f32 %v656_v34  ;;  %v668_v39 = vand.u32 2147483648, %v656_v34  ;;  %v666_v42 = vand.u32 2147483647, %v656_v34  ;;  %vm662_vm11 = vweird.f32 %v656_v34 }
 0x237   : > { %1020 = vpow2.f32 %v950_v35 }
 0x238   : > { %v669_v45 = vor.u32 1.1754944e-38, %v668_v39  ;;  %vm667_vm13 = vcmp.eq.f32.partialorder %v666_v42, 8.507059e+37 }
 0x23c   : > { %v1019_v36 = vpop.eup %1018 }
 0x23d   : > { %v658_v37 = vmul.f32 %v1019_v36, %v656_v34  ;;  %v1021_v40 = vpop.eup %1020  ;;  %vm663_vm10 = vweird.f32 %v1019_v36 }
 0x23e   : > { %v758_v44 = vadd.f32 1.0, %v1021_v40  ;;  %vm664_vm12 = vmor %vm662_vm11, %vm663_vm10 }
 0x23f   : > { %v659_v38 = vsub.f32 1.0, %v658_v37 }
 0x240   : > { %1022 = vrcp.f32 %v758_v44  ;;  %v770_v56 = vand.u32 2147483648, %v758_v44  ;;  %vm764_vm15 = vweird.f32 %v758_v44  ;;  %v768_v57 = vand.u32 2147483647, %v758_v44 }
 0x241   : > { %v660_v41 = vmul.f32 %v1019_v36, %v659_v38 }
 0x242   : > { %v771_v60 = vor.u32 1.1754944e-38, %v770_v56  ;;  %vm769_vm2 = vcmp.eq.f32.partialorder %v768_v57, 8.507059e+37 }
 0x243   : > { %v661_v43 = vadd.f32 %v1019_v36, %v660_v41 }
 0x245   : > { %v665_v46 = vsel %vm664_vm12, %v1019_v36, %v661_v43 }
 0x246   : > { %v670_v61 = vsel %vm667_vm13, %v669_v45, %v665_v46  ;;  %v1023_v49 = vpop.eup %1022 }
 0x247   : > { %v685_v47 = vperm.slane %v670_v61, 1  ;;  %v672_v48 = vperm.slane %v670_v61, 0  ;;  %v698_v50 = vperm.slane %v670_v61, 2  ;;  %v760_v51 = vmul.f32 %v1023_v49, %v758_v44 }
 0x248   : > { %v711_v53 = vperm.slane %v670_v61, 3  ;;  %vm765_vm14 = vweird.f32 %v1023_v49 }
 0x249   : > { %690 = vperm.xlu2 %1005, %v685_v47   ;;  %683 = vperm.xlu1 %1004, %v672_v48   ;;  %v761_v52 = vsub.f32 1.0, %v760_v51  ;;  %vm766_vm1 = vmor %vm764_vm15, %vm765_vm14 }
 0x24a   : > { %677 = vperm.xlu0 %1003, %v672_v48  }
 0x24b   : > { %v762_v54 = vmul.f32 %v1023_v49, %v761_v52 }
 0x24d   : > { %v763_v55 = vadd.f32 %v1023_v49, %v762_v54 }
 0x24f   : > { %v767_v59 = vsel %vm766_vm1, %v1023_v49, %v763_v55 }
 0x250   : > { %v772_v63 = vsel %vm769_vm2, %v771_v60, %v767_v59 }
 0x251   : > { %703 = vperm.xlu2 %1005, %v698_v50   ;;  %696 = vperm.xlu1 %1004, %v685_v47   ;;  %v774_v62 = vperm.slane %v772_v63, 0  ;;  %v800_v9 = vperm.slane %v772_v63, 2  ;;  %v787_v8 = vperm.slane %v772_v63, 1  ;;  %v813_v10 = vperm.slane %v772_v63, 3 }
 0x252   : > { %1006 = vset.pattern.permute.xlu0 %v1377_v23 }
 0x259   : > { %716 = vperm.xlu2 %1005, %v711_v53   ;;  %709 = vperm.xlu1 %1004, %v698_v50  }
 0x25a   : > { %722 = vperm.xlu0 %1006, %v711_v53  }
 0x261   : > { %1008 = vset.pattern.permute.xlu2 %v1377_v23  ;;  %1007 = vset.pattern.permute.xlu1 %v1372_v22 }
 0x262   : > { %1009 = vset.pattern.permute.xlu0 %v1372_v22 }
 0x269   : > { %785 = vperm.xlu2 %1008, %v774_v62   ;;  %779 = vperm.xlu1 %1007, %v774_v62  }
 0x26a   : > { %805 = vperm.xlu0 %1009, %v800_v9  }
 0x271   : > { %798 = vperm.xlu2 %1008, %v787_v8   ;;  %792 = vperm.xlu1 %1007, %v787_v8  }
 0x272   : > { %1012 = vset.pattern.permute.xlu0 %v1377_v23 }
 0x279   : > { %1011 = vset.pattern.permute.xlu2 %v1372_v22  ;;  %1010 = vset.pattern.permute.xlu1 %v1377_v23 }
 0x281   : > { %818 = vperm.xlu2 %1011, %v813_v10   ;;  %811 = vperm.xlu1 %1010, %v800_v9  }
 0x289   : > { %824 = vperm.xlu1 %1010, %v813_v10  }
 0x2a3   : > { %v691_v11 = vpop.permute.xlu2 %690 }
 0x2ab   : > { %v704_v12 = vpop.permute.xlu2 %703 }
 0x2b3   : > { %v717_v13 = vpop.permute.xlu2 %716 }
 0x2bb   : > { %v684_v14 = vpop.permute.xlu1 %683 }
 0x2bc   : > { %v678_v20 = vpop.permute.xlu0 %677 }
 0x2c3   : > { %v786_v15 = vpop.permute.xlu2 %785  ;;  %v697_v18 = vpop.permute.xlu1 %696 }
 0x2c4   : > { %v827_v16 = vsel %vm264_vm0, %v684_v14, %v786_v15 }
 0x2c5   : > { %v835_v17 = vmul.f32 %v827_v16, %v1192_v5 }
 0x2c7   : > { %843 = vst [vmem:[%s1395_s18 + $0x8] sm:$0xff] %v835_v17 }
 0x2cb   : > { %v799_v19 = vpop.permute.xlu2 %798  ;;  %v710_v23 = vpop.permute.xlu1 %709 }
 0x2cc   : > { %v829_v21 = vsel %vm264_vm0, %v697_v18, %v799_v19  ;;  %v723_v24 = vpop.permute.xlu0 %722 }
 0x2cd   : > { %v837_v22 = vmul.f32 %v829_v21, %v1190_v4 }
 0x2cf   : > { %845 = vst [vmem:[%s1395_s18 + $0x18] sm:$0xff] %v837_v22 }
 0x2db   : > { %v819_v5 = vpop.permute.xlu2 %818  ;;  %v780_v25 = vpop.permute.xlu1 %779 }
 0x2dc   : > { %v832_v26 = vsel %vm264_vm0, %v717_v13, %v819_v5  ;;  %v826_v27 = vsel %vm264_vm0, %v678_v20, %v780_v25  ;;  %v806_v28 = vpop.permute.xlu0 %805 }
 0x2dd   : > { %v840_v29 = vmul.f32 %v832_v26, %v1199_v7  ;;  %v834_v58 = vmul.f32 %v826_v27, %v1183_v2  ;;  %v830_v4 = vsel %vm264_vm0, %v704_v12, %v806_v28 }
 0x2de   : > { %v838_v30 = vmul.f32 %v830_v4, %v1179_v0 }
 0x2df   : > { %848 = vst [vmem:[%s1395_s18 + $0x30] sm:$0xff] %v840_v29 }
 0x2e0   : > { %842 = vst [vmem:[%s1395_s18] sm:$0xff] %v834_v58 }
 0x2e1   : > { %846 = vst [vmem:[%s1395_s18 + $0x20] sm:$0xff] %v838_v30 }
 0x2e3   : > { %v793_v31 = vpop.permute.xlu1 %792 }
 0x2e4   : > { %v828_v32 = vsel %vm264_vm0, %v691_v11, %v793_v31 }
 0x2e5   : > { %v836_v33 = vmul.f32 %v828_v32, %v1181_v1 }
 0x2e7   : > { %844 = vst [vmem:[%s1395_s18 + $0x10] sm:$0xff] %v836_v33 }
 0x2f3   : > { %v812_v7 = vpop.permute.xlu1 %811 }
 0x2f4   : > { %v831_v2 = vsel %vm264_vm0, %v710_v23, %v812_v7 }
 0x2f5   : > { %v839_v34 = vmul.f32 %v831_v2, %v1188_v3 }
 0x2f7   : > { %847 = vst [vmem:[%s1395_s18 + $0x28] sm:$0xff] %v839_v34 }
 0x2fb   : > { %v825_v0 = vpop.permute.xlu1 %824 }
 0x2fc   : > { %v833_v35 = vsel %vm264_vm0, %v723_v24, %v825_v0 }
 0x2fd   : > { %v841_v1 = vmul.f32 %v833_v35, %v1197_v6 }
 0x2ff   : > { %849 = vst [vmem:[%s1395_s18 + $0x38] sm:$0xff] %v841_v1 }
 0x300   : > { %1051 = shalt.err (!%p1048_p3)
}
 0x301   : > { %s1090_s16 = smov 128   ;;  %s1091_s17 = smov 8  }
 0x302   : > { %960 = dma.vmem_to_hbm [thread:$0]  (%p1165_p5), %s865_s28, 1024, %s867_s8, %s851_s24, %s1090_s16, %s1090_s16, %s1091_s17  }
 0x303 PF: > { %p966_p4 = scmp.ge.s32.totalorder %s1086_s23, 2  ;;  %s881_s18 = sand.u32 1, %s1074_s21  }
 0x304   : > { %s882_s19 = scalar_lea.sflag [#allocation3], %s881_s18 }
 0x305   : > { %p963_p7 = pnand %p966_p4, %p1169_p6 }
 0x307   : > { %p964_p8 = pneg %p963_p7 }
 0x309   : > { %1069 = dma.done.wait (%p964_p8), %s882_s19, 1024  }
 0x30a   : > { %1071 = vsyncadd (%p964_p8), %s882_s19, 4294966272  ;;  %p16_p9 = scmp.ge.s32.totalorder %s1152_s26, 4   ;;  %s1462_s21 = smov %s1078_s1 }
 0x30b   : > { %s1463_s1 = smov %s1082_s22  ;;  %s1464_s22 = smov %s1163_s29 }
 0x30c   : > { %s1465_s23 = smov %s1152_s26  ;;  %18 = sbr.rel (!%p16_p9) target bundleno = 3 (0x3), region = 82 }
 0x311   :  { %888 = vsyncpa [#allocation3], 1 }
 0x312   :  { %890 = vsyncpa [#allocation3 + $0x1], 1 }

</bundles_post_ra>
